<compile_context>
chip_gen: v6e
topology: v6e:2x2x1
jax: 0.10.0
libtpu: 0.0.40
codegen_flags: <defaults>
</compile_context>

<pallas_src>
import jax
import jax.numpy as jnp
import numpy as np
from jax.experimental import pallas as pl
from jax.experimental.pallas import tpu as pltpu

HIGHEST = jax.lax.Precision.HIGHEST


# ----------------------------------------------------------------------------
# Pallas kernel factory: whole (C, B*HW) slab in one invocation.
# ----------------------------------------------------------------------------
def _make_adcat_kernel(B, C, HW, Cr):
    def kernel(g_ref, x_ref, z_ref, p_ref, o_ref):
        """adcat forward, single grid step.

        g_ref : SMEM (2,)                  = [gamma1, gamma3]
        x_ref : VMEM (C, B*HW)             x  (feature map receiving residual)
        z_ref : VMEM (C, B*HW)             z  (drives the channel attention)
        p_ref : VMEM (C, 2C + 2Cr + 1)     packed [Wx | Wz | fc1^T | fc2 | b]
        o_ref : VMEM (C, B*HW)
        """
        x2 = x_ref[...]                                  # (C, B*HW)
        z2 = z_ref[...]                                  # (C, B*HW)
        params = p_ref[...]                              # (C, 2C+2Cr+1)

        wx = params[:, 0:C]                              # (C, C)
        wz = params[:, C:2 * C]                          # (C, C)
        fc1_t = params[:, 2 * C:2 * C + Cr]              # (C, Cr) = fc1_w^T
        fc2 = params[:, 2 * C + Cr:2 * C + 2 * Cr]       # (C, Cr) as stored
        bias = params[:, 2 * C + 2 * Cr:2 * C + 2 * Cr + 1]   # (C, 1)

        g1 = g_ref[0]
        g3 = g_ref[1]

        # ---- c2 = relu(ConvTranspose1x1(cat(x, z, channel))) ---------------
        # Two K-chunks of the same matmul accumulated in f32; N = B*HW = 512
        # keeps the MXU lane-full.  HIGHEST precision is free (MXU has slack).
        c2 = (jnp.dot(wx, x2, preferred_element_type=jnp.float32,
                      precision=HIGHEST)
              + jnp.dot(wz, z2, preferred_element_type=jnp.float32,
                        precision=HIGHEST)
              + bias)
        c2 = jnp.maximum(c2, 0.0)

        base = x2 + g1 * c2

        # ---- per-batch channel attention + weighted residual ---------------
        # Static Python loop over B; all lane slice offsets are multiples of
        # HW = 256 (128-aligned), so loads/stores stay unmasked full-lane.
        for b in range(B):
            lo, hi = b * HW, (b + 1) * HW
            zb = z2[:, lo:hi]                                       # (C, HW)
            xb = x2[:, lo:hi]                                       # (C, HW)
            zavg = jnp.mean(zb, axis=1, keepdims=True)              # (C, 1)
            h = jnp.maximum(
                jnp.sum(fc1_t * zavg, axis=0, keepdims=True), 0.0)  # (1, Cr)
            w_att = jax.nn.sigmoid(
                jnp.sum(fc2 * h, axis=1, keepdims=True))            # (C, 1)
            o_ref[:, lo:hi] = base[:, lo:hi] + g3 * (w_att * xb)

    return kernel


# ----------------------------------------------------------------------------
# Wrapper: NCHW in / NCHW out.  One B<->C transpose each way so the kernel
# sees a single lane-dense (C, B*HW) slab; parameters packed into one buffer.
# ----------------------------------------------------------------------------
def adcat_pallas(x_nchw, z_nchw, p):
    B, C, H, W = x_nchw.shape
    HW = H * W
    N = B * HW
    Cr = p["fc1_w"].shape[0]

    x2 = x_nchw.reshape(B, C, HW).transpose(1, 0, 2).reshape(C, N)
    z2 = z_nchw.reshape(B, C, HW).transpose(1, 0, 2).reshape(C, N)

    gammas = jnp.stack([p["gamma1"], p["gamma3"]]).astype(jnp.float32)

    # ConvTranspose2d(2C, C, 1) weight W[i, o]: out[o] = sum_i W[i, o] * in[i]
    wx = p["add_w"][:C, :].T                 # (C, C) acting on x channels
    wz = p["add_w"][C:, :].T                 # (C, C) acting on z channels
    fc1_t = p["fc1_w"].T                     # (C, Cr)
    fc2 = p["fc2_w"]                         # (C, Cr) already [out_c, in_r]
    bias = p["add_b"].reshape(C, 1)          # (C, 1)
    packed = jnp.concatenate([wx, wz, fc1_t, fc2, bias], axis=1)  # (C, 2C+2Cr+1)

    out = pl.pallas_call(
        _make_adcat_kernel(B, C, HW, Cr),
        out_shape=jax.ShapeDtypeStruct((C, N), jnp.float32),
        in_specs=[
            pl.BlockSpec(memory_space=pltpu.MemorySpace.SMEM),   # gammas
            pl.BlockSpec(memory_space=pltpu.MemorySpace.VMEM),   # x
            pl.BlockSpec(memory_space=pltpu.MemorySpace.VMEM),   # z
            pl.BlockSpec(memory_space=pltpu.MemorySpace.VMEM),   # packed params
        ],
        out_specs=pl.BlockSpec(memory_space=pltpu.MemorySpace.VMEM),
    )(gammas, x2, z2, packed)

    return out.reshape(C, B, HW).transpose(1, 0, 2).reshape(B, C, H, W)


# ----------------------------------------------------------------------------
# Pure-JAX reference (mirrors the PyTorch module, high precision)
# ----------------------------------------------------------------------------
def adcat_ref(x, z, p):
    zavg = jnp.mean(z, axis=(2, 3))                                    # (B, C)
    h = jnp.maximum(
        jnp.einsum("bc,rc->br", zavg, p["fc1_w"], precision=HIGHEST), 0.0)
    w = jax.nn.sigmoid(
        jnp.einsum("br,cr->bc", h, p["fc2_w"], precision=HIGHEST))     # (B, C)
    xz = jnp.concatenate([x, z], axis=1)                               # (B,2C,H,W)
    c2 = (jnp.einsum("bihw,io->bohw", xz, p["add_w"], precision=HIGHEST)
          + p["add_b"][None, :, None, None])
    c2 = jnp.maximum(c2, 0.0)
    return x + p["gamma1"] * c2 + p["gamma3"] * w[:, :, None, None] * x


# ----------------------------------------------------------------------------
# Deterministic parameter construction (shapes match the module __init__)
# ----------------------------------------------------------------------------
def make_adcat_params(key, C):
    Cr = max(C // 6, 1)
    ks = jax.random.split(key, 4)
    return {
        # Conv2d(C, Cr, 1, bias=False).weight[:, :, 0, 0]  -> (Cr, C)
        "fc1_w": 0.2 * jax.random.normal(ks[0], (Cr, C), jnp.float32),
        # Conv2d(Cr, C, 1, bias=False).weight[:, :, 0, 0]  -> (C, Cr)
        "fc2_w": 0.2 * jax.random.normal(ks[1], (C, Cr), jnp.float32),
        # ConvTranspose2d(2C, C, 1).weight[:, :, 0, 0]     -> (2C, C)
        "add_w": 0.1 * jax.random.normal(ks[2], (2 * C, C), jnp.float32),
        "add_b": 0.1 * jax.random.normal(ks[3], (C,), jnp.float32),
        # TODO(synk): zeros in the original __init__; nonzero to exercise path.
        "gamma1": jnp.float32(0.5),
        "gamma3": jnp.float32(0.3),
    }


# ----------------------------------------------------------------------------
if __name__ == "__main__":
    key = jax.random.PRNGKey(0)
    B, C, H, W = 2, 12, 16, 16          # H*W = 256 -> lane-dense (2 x 128)

    kx, kz, kp = jax.random.split(key, 3)
    x = jax.random.normal(kx, (B, C, H, W), jnp.float32)
    z = jax.random.normal(kz, (B, C, H, W), jnp.float32)
    params = make_adcat_params(kp, C)

    fwd = jax.jit(adcat_pallas)
    out = jax.block_until_ready(fwd(x, z, params))

    ref = adcat_ref(x, z, params)
    np.testing.assert_allclose(np.asarray(out), np.asarray(ref),
                               rtol=5e-3, atol=5e-3)

    print("KERNEL_OK")
</pallas_src>

<mosaic_0001>
module attributes {stable_mosaic.version = 11 : i64} {
  func.func @kernel(%arg0: memref<2xf32, #tpu.memory_space<smem>>, %arg1: memref<12x512xf32, #tpu.memory_space<vmem>>, %arg2: memref<12x512xf32, #tpu.memory_space<vmem>>, %arg3: memref<12x29xf32, #tpu.memory_space<vmem>>, %arg4: memref<12x512xf32, #tpu.memory_space<vmem>>) attributes {dimension_semantics = [], scalar_prefetch = 0 : i64, scratch_operands = 0 : i64, tpu.core_type = #tpu.core_type<tc>} {
    %c0 = arith.constant 0 : index
    %c0_0 = arith.constant 0 : index
    %0 = vector.load %arg1[%c0, %c0_0] : memref<12x512xf32, #tpu.memory_space<vmem>>, vector<12x512xf32>
    %c0_1 = arith.constant 0 : index
    %c0_2 = arith.constant 0 : index
    %1 = vector.load %arg2[%c0_1, %c0_2] : memref<12x512xf32, #tpu.memory_space<vmem>>, vector<12x512xf32>
    %c0_3 = arith.constant 0 : index
    %c0_4 = arith.constant 0 : index
    %2 = vector.load %arg3[%c0_3, %c0_4] : memref<12x29xf32, #tpu.memory_space<vmem>>, vector<12x29xf32>
    %3 = vector.extract_strided_slice %2 {offsets = [0, 0], sizes = [12, 12], strides = [1, 1]} : vector<12x29xf32> to vector<12x12xf32>
    %4 = vector.extract_strided_slice %2 {offsets = [0, 12], sizes = [12, 12], strides = [1, 1]} : vector<12x29xf32> to vector<12x12xf32>
    %5 = vector.extract_strided_slice %2 {offsets = [0, 24], sizes = [12, 2], strides = [1, 1]} : vector<12x29xf32> to vector<12x2xf32>
    %6 = vector.extract_strided_slice %2 {offsets = [0, 26], sizes = [12, 2], strides = [1, 1]} : vector<12x29xf32> to vector<12x2xf32>
    %7 = vector.extract_strided_slice %2 {offsets = [0, 28], sizes = [12, 1], strides = [1, 1]} : vector<12x29xf32> to vector<12x1xf32>
    %c0_5 = arith.constant 0 : index
    %8 = memref.load %arg0[%c0_5] : memref<2xf32, #tpu.memory_space<smem>>
    %c1 = arith.constant 1 : index
    %9 = memref.load %arg0[%c1] : memref<2xf32, #tpu.memory_space<smem>>
    %cst = arith.constant dense<0.000000e+00> : vector<12x512xf32>
    %10 = tpu.matmul %3, %0, %cst {dimension_numbers = #tpu.dot_dimension_numbers<[1], [0], [0], [1], [0, 0, 1, 1], [], []>, precision = #tpu.contract_precision<fp32>} : vector<12x12xf32>, vector<12x512xf32>, vector<12x512xf32> -> vector<12x512xf32>
    %cst_6 = arith.constant dense<0.000000e+00> : vector<12x512xf32>
    %11 = tpu.matmul %4, %1, %cst_6 {dimension_numbers = #tpu.dot_dimension_numbers<[1], [0], [0], [1], [0, 0, 1, 1], [], []>, precision = #tpu.contract_precision<fp32>} : vector<12x12xf32>, vector<12x512xf32>, vector<12x512xf32> -> vector<12x512xf32>
    %12 = arith.addf %10, %11 : vector<12x512xf32>
    %13 = vector.broadcast %7 : vector<12x1xf32> to vector<12x512xf32>
    %14 = arith.addf %12, %13 : vector<12x512xf32>
    %cst_7 = arith.constant 0.000000e+00 : f32
    %15 = vector.broadcast %cst_7 : f32 to vector<12x512xf32>
    %16 = arith.maximumf %14, %15 : vector<12x512xf32>
    %17 = vector.broadcast %8 : f32 to vector<12x512xf32>
    %18 = arith.mulf %17, %16 : vector<12x512xf32>
    %19 = arith.addf %0, %18 : vector<12x512xf32>
    %20 = vector.extract_strided_slice %1 {offsets = [0, 0], sizes = [12, 256], strides = [1, 1]} : vector<12x512xf32> to vector<12x256xf32>
    %21 = vector.extract_strided_slice %0 {offsets = [0, 0], sizes = [12, 256], strides = [1, 1]} : vector<12x512xf32> to vector<12x256xf32>
    %cst_8 = arith.constant dense<0.000000e+00> : vector<12xf32>
    %22 = vector.multi_reduction <add>, %20, %cst_8 [1] : vector<12x256xf32> to vector<12xf32>
    %23 = vector.shape_cast %22 : vector<12xf32> to vector<12x1xf32>
    %cst_9 = arith.constant 2.560000e+02 : f32
    %24 = vector.broadcast %cst_9 : f32 to vector<12x1xf32>
    %25 = arith.divf %23, %24 : vector<12x1xf32>
    %26 = vector.broadcast %25 : vector<12x1xf32> to vector<12x2xf32>
    %27 = arith.mulf %5, %26 : vector<12x2xf32>
    %cst_10 = arith.constant dense<0.000000e+00> : vector<2xf32>
    %28 = vector.multi_reduction <add>, %27, %cst_10 [0] : vector<12x2xf32> to vector<2xf32>
    %29 = vector.shape_cast %28 : vector<2xf32> to vector<1x2xf32>
    %cst_11 = arith.constant 0.000000e+00 : f32
    %30 = vector.broadcast %cst_11 : f32 to vector<1x2xf32>
    %31 = arith.maximumf %29, %30 : vector<1x2xf32>
    %32 = vector.broadcast %31 : vector<1x2xf32> to vector<12x2xf32>
    %33 = arith.mulf %6, %32 : vector<12x2xf32>
    %cst_12 = arith.constant dense<0.000000e+00> : vector<12xf32>
    %34 = vector.multi_reduction <add>, %33, %cst_12 [1] : vector<12x2xf32> to vector<12xf32>
    %35 = vector.shape_cast %34 : vector<12xf32> to vector<12x1xf32>
    %36 = arith.negf %35 : vector<12x1xf32>
    %37 = math.exp %36 : vector<12x1xf32>
    %cst_13 = arith.constant 1.000000e+00 : f32
    %38 = vector.broadcast %cst_13 : f32 to vector<12x1xf32>
    %39 = arith.addf %38, %37 : vector<12x1xf32>
    %40 = arith.divf %38, %39 : vector<12x1xf32>
    %41 = vector.extract_strided_slice %19 {offsets = [0, 0], sizes = [12, 256], strides = [1, 1]} : vector<12x512xf32> to vector<12x256xf32>
    %42 = vector.broadcast %40 : vector<12x1xf32> to vector<12x256xf32>
    %43 = arith.mulf %42, %21 : vector<12x256xf32>
    %44 = vector.broadcast %9 : f32 to vector<12x256xf32>
    %45 = arith.mulf %44, %43 : vector<12x256xf32>
    %46 = arith.addf %41, %45 : vector<12x256xf32>
    %c0_14 = arith.constant 0 : index
    %c0_15 = arith.constant 0 : index
    %47 = vector.load %arg4[%c0_14, %c0_15] : memref<12x512xf32, #tpu.memory_space<vmem>>, vector<12x256xf32>
    tpu.vector_store %arg4[%c0_14, %c0_15], %46 {strides = array<i32>} : memref<12x512xf32, #tpu.memory_space<vmem>>, vector<12x256xf32>,
    %48 = vector.extract_strided_slice %1 {offsets = [0, 256], sizes = [12, 256], strides = [1, 1]} : vector<12x512xf32> to vector<12x256xf32>
    %49 = vector.extract_strided_slice %0 {offsets = [0, 256], sizes = [12, 256], strides = [1, 1]} : vector<12x512xf32> to vector<12x256xf32>
    %cst_16 = arith.constant dense<0.000000e+00> : vector<12xf32>
    %50 = vector.multi_reduction <add>, %48, %cst_16 [1] : vector<12x256xf32> to vector<12xf32>
    %51 = vector.shape_cast %50 : vector<12xf32> to vector<12x1xf32>
    %cst_17 = arith.constant 2.560000e+02 : f32
    %52 = vector.broadcast %cst_17 : f32 to vector<12x1xf32>
    %53 = arith.divf %51, %52 : vector<12x1xf32>
    %54 = vector.broadcast %53 : vector<12x1xf32> to vector<12x2xf32>
    %55 = arith.mulf %5, %54 : vector<12x2xf32>
    %cst_18 = arith.constant dense<0.000000e+00> : vector<2xf32>
    %56 = vector.multi_reduction <add>, %55, %cst_18 [0] : vector<12x2xf32> to vector<2xf32>
    %57 = vector.shape_cast %56 : vector<2xf32> to vector<1x2xf32>
    %cst_19 = arith.constant 0.000000e+00 : f32
    %58 = vector.broadcast %cst_19 : f32 to vector<1x2xf32>
    %59 = arith.maximumf %57, %58 : vector<1x2xf32>
    %60 = vector.broadcast %59 : vector<1x2xf32> to vector<12x2xf32>
    %61 = arith.mulf %6, %60 : vector<12x2xf32>
    %cst_20 = arith.constant dense<0.000000e+00> : vector<12xf32>
    %62 = vector.multi_reduction <add>, %61, %cst_20 [1] : vector<12x2xf32> to vector<12xf32>
    %63 = vector.shape_cast %62 : vector<12xf32> to vector<12x1xf32>
    %64 = arith.negf %63 : vector<12x1xf32>
    %65 = math.exp %64 : vector<12x1xf32>
    %cst_21 = arith.constant 1.000000e+00 : f32
    %66 = vector.broadcast %cst_21 : f32 to vector<12x1xf32>
    %67 = arith.addf %66, %65 : vector<12x1xf32>
    %68 = arith.divf %66, %67 : vector<12x1xf32>
    %69 = vector.extract_strided_slice %19 {offsets = [0, 256], sizes = [12, 256], strides = [1, 1]} : vector<12x512xf32> to vector<12x256xf32>
    %70 = vector.broadcast %68 : vector<12x1xf32> to vector<12x256xf32>
    %71 = arith.mulf %70, %49 : vector<12x256xf32>
    %72 = vector.broadcast %9 : f32 to vector<12x256xf32>
    %73 = arith.mulf %72, %71 : vector<12x256xf32>
    %74 = arith.addf %69, %73 : vector<12x256xf32>
    %c0_22 = arith.constant 0 : index
    %c256 = arith.constant 256 : index
    %75 = vector.load %arg4[%c0_22, %c256] : memref<12x512xf32, #tpu.memory_space<vmem>>, vector<12x256xf32>
    tpu.vector_store %arg4[%c0_22, %c256], %74 {strides = array<i32>} : memref<12x512xf32, #tpu.memory_space<vmem>>, vector<12x256xf32>,
    return
  }
}

</mosaic_0001>

<bundles_post_ra>
// kernel: adcat_pallas.1
= control target key start
LH: loop header
LB: loop body
LE: loop exit
PB: predicated region body
PF: predicated region fallthrough
CT: control target
= control target key end

     0   :  { %9 = vsyncpa [#allocation3], 0  ;;  %s3323_s0 = inlined_call_operand.vmem [shape: f32[2], index: 0, kind: input, shape index: {}]   ;;  %s3324_s1 = inlined_call_operand.vmem [shape: f32[12,512], index: 1, kind: input, shape index: {}]   ;;  %s3325_s2 = inlined_call_operand.vmem [shape: f32[12,512], index: 2, kind: input, shape index: {}]   ;;  %s3326_s3 = inlined_call_operand.vmem [shape: f32[12,29], index: 3, kind: input, shape index: {}]   ;;  %s3327_s4 = inlined_call_operand.vmem [shape: f32[12,512], index: 4, kind: output, shape index: {}]  }
   0x1   :  { %s16_s17 = sshll.u32 %s3323_s0, 4  ;;  %s17_s17 = int_to_ptr.vmem [resolvable:$true] %s16_s17 }
   0x2   :  { %s2471_s18 = scalar_lea.vmem %s17_s17, 16  ;;  %p2476_p1 = scmp.lt.s32.totalorder %s17_s17, %s17_s17 }
   0x3   :  { %p2472_p0 = scmp.ne.s32.totalorder %s17_s17, %s2471_s18  ;;  %p2477_p2 = scmp.lt.s32.totalorder %s2471_s18, %s2471_s18 }
   0x5   :  { %p2478_p3 = por %p2477_p2, %p2476_p1 }
   0x7   :  { %p2479_p4 = pnand %p2478_p3, %p2472_p0 }
   0x9   :  { %2482 = shalt.err (!%p2479_p4)
}
   0xa   :  { %s2485_s19 = smov [#allocation2]  }
   0xb   :  { %19 = dma.vmem_to_smem %s17_s17, 16, %s2485_s19, [#allocation3]  }
   0xc   :  { %2483 = dma.done.wait [#allocation3], 16  }
   0xd   :  { %2484 = vsyncadd [#allocation3], 4294967280 }
   0xe   :  { %29 = sfence }
   0xf   :  { %v2522_v0 = vld [vmem:[%s3326_s3] sm:$0xff]  ;;  %v39_v2 = vld [vmem:[%s3325_s2 + $0x8] sm:$0xff]  ;;  %vm61_vm0 = vcmask 1043456   ;;  %s2486_s25 = smov 116   ;;  %v44_v13 = vld [vmem:[%s3325_s2 + $0x30] sm:$0xf] }
  0x10   :  { %v38_v1 = vld [vmem:[%s3325_s2] sm:$0xff]  ;;  %52 = vrot.lane.b32.xlu0 %v2522_v0, %s2486_s25  ;;  %v2531_v3 = vand.u32 4294901760, %v39_v2  ;;  %v2541_v7 = vld [vmem:[%s3326_s3 + $0x8] sm:$0xf]  ;;  %v45_v16 = vld [vmem:[%s3325_s2 + $0x38] sm:$0xf] }
  0x11   :  { %v2291_v4 = vadd.f32 %v39_v2, %v38_v1  ;;  %v2533_v5 = vand.u32 4294901760, %v38_v1  ;;  %v42_v6 = vld [vmem:[%s3325_s2 + $0x20] sm:$0xf]  ;;  %v43_v8 = vld [vmem:[%s3325_s2 + $0x28] sm:$0xf]  ;;  %v69_v19 = vsel %vm61_vm0, %v44_v13, 0 }
  0x12   :  { %v63_v9 = vsel %vm61_vm0, %v42_v6, 0  ;;  %v2294_v10 = vsel %vm61_vm0, %v42_v6, 0.0  ;;  %v66_v11 = vsel %vm61_vm0, %v43_v8, 0  ;;  %v2295_v15 = vsel %vm61_vm0, %v43_v8, 0.0  ;;  %v40_v40 = vld [vmem:[%s3325_s2 + $0x10] sm:$0xff]  ;;  %v41_v41 = vld [vmem:[%s3325_s2 + $0x18] sm:$0xff] }
  0x13   :  { %2292 = vadd.xlane.f32.xlu1 %v2291_v4  ;;  %v2549_v12 = vand.u32 4294901760, %v63_v9  ;;  %v2554_v14 = vand.u32 4294901760, %v66_v11  ;;  %v2296_v18 = vadd.f32 %v2295_v15, %v2294_v10  ;;  %v2566_v20 = vsub.f32 %v39_v2, %v2531_v3  ;;  %s2488_s23 = smov 2   ;;  %s48_s28 = sld [smem:[#allocation2]] }
  0x14   :  { %54 = vrot.lane.b32.xlu0 %v2541_v7, %s2486_s25  ;;  %v2569_v21 = vsub.f32 %v38_v1, %v2533_v5  ;;  %v72_v22 = vsel %vm61_vm0, %v45_v16, 0  ;;  %v2370_v23 = vsel %vm61_vm0, %v44_v13, 0.0  ;;  %v2371_v24 = vsel %vm61_vm0, %v45_v16, 0.0  ;;  %s3231_s29 = sld [smem:[#allocation2 + $0x1]] }
  0x15   :  { %v2562_v17 = vsub.f32 %v63_v9, %v2549_v12  ;;  %103 = vmatprep.subr.mxu0 %v2554_v14  ;;  %v2372_v25 = vadd.f32 %v2371_v24, %v2370_v23  ;;  %v2578_v26 = vsub.f32 %v66_v11, %v2554_v14  ;;  %v207_v28 = vand.u32 4294901760, %v2566_v20 }
  0x16   :  { %105 = vmatpush1.msra.mxu0 %v2549_v12  ;;  %v213_v29 = vand.u32 4294901760, %v2569_v21  ;;  %v2487_v32 = vmov 0.0   ;;  %v2367_v42 = vadd.f32 %v41_v41, %v40_v40  ;;  %vm56_vm1 = vcmask 97280  }
  0x17   :  { %2297 = vadd.xlane.f32.xlu1 %v2296_v18  ;;  %107 = vmatprep.subr.mxu0 %v2531_v3  ;;  %v201_v27 = vand.u32 4294901760, %v2562_v17  ;;  %v195_v30 = vand.u32 4294901760, %v2578_v26  ;;  %v208_v33 = vsub.f32 %v2566_v20, %v207_v28  ;;  %v2607_v43 = vand.u32 4294901760, %v72_v22 }
  0x18   :  { %109 = vmatpush1.msra.mxu0 %v2533_v5  ;;  %249 = vmatprep.mubr.f32.mxu1 %v2487_v32  ;;  %v214_v34 = vsub.f32 %v2569_v21, %v213_v29  ;;  %v2610_v46 = vand.u32 4294901760, %v69_v19  ;;  %v2614_v48 = vand.u32 4294901760, %v41_v41  ;;  %v2626_v53 = vand.u32 4294901760, %v40_v40 }
  0x19   :  { %v202_v31 = vsub.f32 %v2562_v17, %v201_v27  ;;  %142 = vmatprep.mubr.f32.mxu0 %v2487_v32  ;;  %294 = vmatprep.subr.mxu0 %v2578_v26  ;;  %v196_v35 = vsub.f32 %v2578_v26, %v195_v30  ;;  %v209_v38 = vand.u32 4294901760, %v208_v33  ;;  %v2617_v49 = vsub.f32 %v72_v22, %v2607_v43 }
  0x1a   :  { %v215_v39 = vand.u32 4294901760, %v214_v34  ;;  %v2629_v54 = vsub.f32 %v69_v19, %v2610_v46  ;;  %v2638_v57 = vsub.f32 %v41_v41, %v2614_v48  ;;  %v2651_v61 = vsub.f32 %v40_v40, %v2626_v53 }
  0x1b   :  { %2373 = vadd.xlane.f32.xlu1 %v2372_v25  ;;  %v203_v36 = vand.u32 4294901760, %v202_v31  ;;  %v197_v37 = vand.u32 4294901760, %v196_v35  ;;  %v735_v58 = vand.u32 4294901760, %v2617_v49  ;;  %vm2304_vm2 = vcmask 212160  }
  0x1c   :  { %v741_v1 = vand.u32 4294901760, %v2629_v54  ;;  %v747_v4 = vand.u32 4294901760, %v2638_v57  ;;  %v753_v10 = vand.u32 4294901760, %v2651_v61  ;;  %vm2306_vm3 = vcmask 208064  }
  0x1d   :  { %198 = vmatprep.subr.mxu1 %v197_v37  ;;  %v736_v2 = vsub.f32 %v2617_v49, %v735_v58  ;;  %vm2330_vm4 = vcmask 15360   ;;  %vm2334_vm5 = vcmask 11264  }
  0x1e   :  { %204 = vmatpush1.msra.mxu1 %v203_v36  ;;  %v742_v9 = vsub.f32 %v2629_v54, %v741_v1  ;;  %v748_v13 = vsub.f32 %v2638_v57, %v747_v4 }
  0x1f   :  { %210 = vmatprep.subr.mxu1 %v209_v38  ;;  %v737_v11 = vand.u32 4294901760, %v736_v2 }
  0x20   :  { %216 = vmatpush1.msra.mxu1 %v215_v39  ;;  %v749_v15 = vand.u32 4294901760, %v748_v13 }
  0x21   :  { %382 = vmatprep.subr.mxu1 %v2554_v14 }
  0x33   :  { %2368 = vadd.xlane.f32.xlu0 %v2367_v42 }
  0x82   :  { %v53_v44 = vpop.permute.xlu0 %52 }
  0x83   :  { %v57_v45 = vsel %vm56_vm1, %v53_v44, 0  ;;  %v1154_v44 = vsel %vm56_vm1, %v2522_v0, 0 }
  0x84   :  { %v2612_v47 = vand.u32 4294901760, %v57_v45 }
  0x86   :  { %v2620_v50 = vsub.f32 %v57_v45, %v2612_v47  ;;  %v55_v51 = vpop.permute.xlu0 %54  ;;  %251 = vmatmul.mubr.f32.vlgmr.msra.gmra.mxu1 %v2612_v47 }
  0x87   :  { %v59_v52 = vsel %vm56_vm1, %v55_v51, 0  ;;  %256 = vmatprep.mubr.f32.mxu1 %v2487_v32  ;;  %384 = vmatpush1.msra.mxu1 %v2549_v12 }
  0x88   :  { %v2631_v55 = vand.u32 4294901760, %v59_v52  ;;  %386 = vmatprep.subr.mxu1 %v2531_v3  ;;  %v2635_v56 = vand.u32 4294901760, %v2620_v50 }
  0x89   :  { %388 = vmatpush1.msra.mxu1 %v2533_v5 }
  0x8a   :  { %v2643_v59 = vsub.f32 %v59_v52, %v2631_v55  ;;  %258 = vmatmul.mubr.f32.gmra.mxu1 %v2631_v55  ;;  %v146_v60 = vsub.f32 %v2620_v50, %v2635_v56  ;;  %560 = vmatprep.subr.mxu1 %v2554_v14  ;;  %v754_v14 = vsub.f32 %v2651_v61, %v753_v10 }
  0x8b   :  { %421 = vmatprep.mubr.f32.mxu1 %v2487_v32 }
  0x8c   :  { %v2653_v62 = vand.u32 4294901760, %v146_v60  ;;  %v2656_v63 = vand.u32 4294901760, %v2643_v59  ;;  %v755_v18 = vand.u32 4294901760, %v754_v14 }
  0x8e   :  { %148 = vmatmul.mubr.f32.vlgmr.msra.gmra.mxu0 %v2653_v62  ;;  %425 = vmatmul.mubr.f32.vlgmr.msra.gmra.mxu1 %v2635_v56  ;;  %v157_v6 = vsub.f32 %v2643_v59, %v2656_v63 }
  0x8f   :  { %153 = vmatprep.mubr.f32.mxu0 %v2487_v32  ;;  %430 = vmatprep.mubr.f32.mxu1 %v2487_v32 }
  0x90   :  { %v2669_v8 = vand.u32 4294901760, %v157_v6  ;;  %297 = vmatpush1.msra.mxu0 %v2562_v17  ;;  %562 = vmatpush1.msra.mxu1 %v2549_v12  ;;  %v2689_v12 = vld [vmem:[%s3324_s1 + $0x28] sm:$0xf] }
  0x91   :  { %300 = vmatprep.subr.mxu0 %v2566_v20  ;;  %564 = vmatprep.subr.mxu1 %v2531_v3  ;;  %3344 = vst [vmem:[#allocation5_spill] sm:$0xff] %v2689_v12  ;;  %v743_v3 = vand.u32 4294901760, %v742_v9  ;;  %v1162_v16 = vsel %vm61_vm0, %v2689_v12, 0  ;;  %v2722_v17 = vld [vmem:[%s3324_s1 + $0x8] sm:$0xff] }
  0x92   :  { %159 = vmatmul.mubr.f32.gmra.mxu0 %v2669_v8  ;;  %434 = vmatmul.mubr.f32.gmra.mxu1 %v2656_v63  ;;  %v2713_v19 = vand.u32 4294901760, %v1162_v16  ;;  %3346 = vst [vmem:[#allocation7_spill] sm:$0xff] %v2722_v17  ;;  %v2733_v25 = vand.u32 4294901760, %v2722_v17 }
  0x93   :  { %303 = vmatpush1.msra.mxu0 %v2569_v21  ;;  %336 = vmatprep.mubr.f32.mxu0 %v2487_v32  ;;  %v2741_v21 = vld [vmem:[%s3324_s1] sm:$0xff] }
  0x94   :  { %566 = vmatpush1.msra.mxu1 %v2533_v5  ;;  %599 = vmatprep.mubr.f32.mxu1 %v2487_v32  ;;  %v2705_v5 = vld [vmem:[%s3324_s1 + $0x20] sm:$0xf]  ;;  %v2736_v26 = vsub.f32 %v1162_v16, %v2713_v19  ;;  %3347 = vst [vmem:[#allocation8_spill] sm:$0xff] %v2741_v21  ;;  %v2754_v31 = vand.u32 4294901760, %v2741_v21  ;;  %v2761_v34 = vsub.f32 %v2722_v17, %v2733_v25 }
  0x95   :  { %471 = vmatprep.subr.mxu0 %v195_v30  ;;  %738 = vmatprep.subr.mxu1 %v737_v11  ;;  %3345 = vst [vmem:[#allocation6_spill] sm:$0xff] %v2705_v5  ;;  %v1159_v22 = vsel %vm61_vm0, %v2705_v5, 0 }
  0x96   :  { %339 = vmatmul.mubr.f32.vlgmr.msra.gmra.mxu0 %v2620_v50  ;;  %601 = vmatmul.mubr.f32.vlgmr.msra.gmra.mxu1 %v2612_v47  ;;  %v2728_v24 = vand.u32 4294901760, %v1159_v22  ;;  %v1291_v33 = vand.u32 4294901760, %v2736_v26  ;;  %v2775_v39 = vsub.f32 %v2741_v21, %v2754_v31  ;;  %v1303_v42 = vand.u32 4294901760, %v2761_v34 }
  0x97   :  { %344 = vmatprep.mubr.f32.mxu0 %v2487_v32  ;;  %606 = vmatprep.mubr.f32.mxu1 %v2487_v32 }
  0x98   :  { %475 = vmatpush1.msra.mxu0 %v201_v27  ;;  %744 = vmatpush1.msra.mxu1 %v743_v3  ;;  %v2751_v30 = vsub.f32 %v1159_v22, %v2728_v24  ;;  %v1292_v41 = vsub.f32 %v2736_v26, %v1291_v33  ;;  %v1309_v51 = vand.u32 4294901760, %v2775_v39  ;;  %v1304_v60 = vsub.f32 %v2761_v34, %v1303_v42 }
  0x99   :  { %479 = vmatprep.subr.mxu0 %v207_v28  ;;  %750 = vmatprep.subr.mxu1 %v749_v15  ;;  %v2874_v15 = vld [vmem:[%s3324_s1 + $0x18] sm:$0xff] }
  0x9a   :  { %347 = vmatmul.mubr.f32.gmra.mxu0 %v2643_v59  ;;  %608 = vmatmul.mubr.f32.gmra.mxu1 %v2631_v55  ;;  %v1297_v38 = vand.u32 4294901760, %v2751_v30  ;;  %v1310_v6 = vsub.f32 %v2775_v39, %v1309_v51  ;;  %3350 = vst [vmem:[#allocation11_spill] sm:$0xff] %v2874_v15 }
  0x9b   :  { %483 = vmatpush1.msra.mxu0 %v213_v29  ;;  %516 = vmatprep.mubr.f32.mxu0 %v2487_v32 }
  0x9c   :  { %v2293_v23 = vpop.xlane.xlu1 %2292  ;;  %756 = vmatpush1.msra.mxu1 %v755_v18  ;;  %789 = vmatprep.mubr.f32.mxu1 %v2487_v32 }
  0x9d   :  { %v2300_v20 = vmul.f32 0.00390625, %v2293_v23  ;;  %643 = vmatprep.subr.mxu0 %v2607_v43  ;;  %922 = vmatprep.subr.mxu1 %v2607_v43  ;;  %v2887_v23 = vld [vmem:[%s3324_s1 + $0x10] sm:$0xff] }
  0x9e   :  { %518 = vmatmul.mubr.f32.vlgmr.msra.gmra.mxu0 %v2612_v47  ;;  %791 = vmatmul.mubr.f32.vlgmr.msra.gmra.mxu1 %v2612_v47  ;;  %3351 = vst [vmem:[#allocation12_spill] sm:$0xff] %v2887_v23 }
  0x9f   :  { %v2302_v27 = vmul.f32 %v2300_v20, %v2522_v0  ;;  %523 = vmatprep.mubr.f32.mxu0 %v2487_v32  ;;  %796 = vmatprep.mubr.f32.mxu1 %v2487_v32 }
  0xa0   :  { %v2298_v28 = vpop.xlane.xlu1 %2297  ;;  %645 = vmatpush1.msra.mxu0 %v2610_v46  ;;  %924 = vmatpush1.msra.mxu1 %v2610_v46 }
  0xa1   :  { %v2301_v29 = vmul.f32 0.00390625, %v2298_v28  ;;  %647 = vmatprep.subr.mxu0 %v2614_v48  ;;  %926 = vmatprep.subr.mxu1 %v2614_v48  ;;  %v2305_v35 = vsel %vm2304_vm2, %v2302_v27, 0.0  ;;  %v2895_v27 = vand.u32 4294901760, %v2874_v15 }
  0xa2   :  { %525 = vmatmul.mubr.f32.gmra.mxu0 %v2631_v55  ;;  %798 = vmatmul.mubr.f32.gmra.mxu1 %v2631_v55 }
  0xa3   :  { %v2303_v36 = vmul.f32 %v2301_v29, %v2541_v7  ;;  %649 = vmatpush1.msra.mxu0 %v2626_v53  ;;  %682 = vmatprep.mubr.f32.mxu0 %v2487_v32 }
  0xa4   :  { %928 = vmatpush1.msra.mxu1 %v2626_v53  ;;  %961 = vmatprep.mubr.f32.mxu1 %v2487_v32 }
  0xa5   :  { %v2307_v37 = vsel %vm2306_vm3, %v2303_v36, 0.0  ;;  %834 = vmatprep.subr.mxu0 %v2617_v49  ;;  %1100 = vmatprep.subr.mxu1 %v2607_v43  ;;  %v1298_v43 = vsub.f32 %v2751_v30, %v1297_v38  ;;  %v1311_v49 = vand.u32 4294901760, %v1310_v6 }
  0xa6   :  { %v2308_v40 = vadd.f32 %v2307_v37, %v2305_v35  ;;  %688 = vmatmul.mubr.f32.vlgmr.msra.gmra.mxu0 %v2653_v62  ;;  %965 = vmatmul.mubr.f32.vlgmr.msra.gmra.mxu1 %v2635_v56  ;;  %v1293_v56 = vand.u32 4294901760, %v1292_v41  ;;  %v2800_v62 = vand.u32 4294901760, %v1154_v44  ;;  %v2902_v35 = vand.u32 4294901760, %v2887_v23 }
  0xa7   :  { %693 = vmatprep.mubr.f32.mxu0 %v2487_v32  ;;  %970 = vmatprep.mubr.f32.mxu1 %v2487_v32 }
  0xa8   :  { %v2309_v45 = vrot.slane %v2308_v40, 4  ;;  %837 = vmatpush1.msra.mxu0 %v2629_v54  ;;  %1102 = vmatpush1.msra.mxu1 %v2610_v46  ;;  %v1156_v46 = vsel %vm56_vm1, %v2541_v7, 0  ;;  %v2818_v11 = vsub.f32 %v1154_v44, %v2800_v62  ;;  %v2839_v54 = vld [vmem:[%s3324_s1 + $0x38] sm:$0xf] }
  0xa9   :  { %840 = vmatprep.subr.mxu0 %v2638_v57  ;;  %1104 = vmatprep.subr.mxu1 %v2614_v48  ;;  %v1299_v48 = vand.u32 4294901760, %v1298_v43  ;;  %v2815_v9 = vand.u32 4294901760, %v1156_v46  ;;  %3348 = vst [vmem:[#allocation9_spill] sm:$0xff] %v2839_v54  ;;  %v2374_v57 = vpop.xlane.xlu1 %2373 }
  0xaa   :  { %v2310_v52 = vadd.f32 %v2309_v45, %v2308_v40  ;;  %699 = vmatmul.mubr.f32.gmra.mxu0 %v2669_v8  ;;  %974 = vmatmul.mubr.f32.gmra.mxu1 %v2656_v63  ;;  %v1305_v8 = vand.u32 4294901760, %v1304_v60  ;;  %v2376_v3 = vmul.f32 0.00390625, %v2374_v57  ;;  %v2920_v45 = vsub.f32 %v2874_v15, %v2895_v27 }
  0xab   :  { %843 = vmatpush1.msra.mxu0 %v2651_v61  ;;  %876 = vmatprep.mubr.f32.mxu0 %v2487_v32  ;;  %v2829_v13 = vsub.f32 %v1156_v46, %v2815_v9  ;;  %v1168_v61 = vsel %vm61_vm0, %v2839_v54, 0 }
  0xac   :  { %v2311_v2 = vrot.slane %v2310_v52, 2  ;;  %1106 = vmatpush1.msra.mxu1 %v2626_v53  ;;  %1139 = vmatprep.mubr.f32.mxu1 %v2487_v32  ;;  %v2378_v20 = vmul.f32 %v2376_v3, %v2541_v7 }
  0xad   :  { %1011 = vmatprep.subr.mxu0 %v735_v58  ;;  %1294 = vmatprep.subr.mxu1 %v1293_v56 }
  0xae   :  { %v2312_v63 = vadd.f32 %v2311_v2, %v2310_v52  ;;  %879 = vmatmul.mubr.f32.vlgmr.msra.gmra.mxu0 %v2620_v50  ;;  %1141 = vmatmul.mubr.f32.vlgmr.msra.gmra.mxu1 %v2612_v47  ;;  %v2834_v50 = vand.u32 4294901760, %v2818_v11  ;;  %v2380_v41 = vsel %vm2306_vm3, %v2378_v20, 0.0  ;;  %v2927_v52 = vsub.f32 %v2887_v23, %v2902_v35 }
  0xaf   :  { %884 = vmatprep.mubr.f32.mxu0 %v2487_v32  ;;  %1146 = vmatprep.mubr.f32.mxu1 %v2487_v32 }
  0xb0   :  { %v2313_v53 = vrot.slane %v2312_v63, 1  ;;  %1015 = vmatpush1.msra.mxu0 %v741_v1  ;;  %1300 = vmatpush1.msra.mxu1 %v1299_v48  ;;  %v1843_v48 = vand.u32 4294901760, %v2920_v45 }
  0xb1   :  { %1019 = vmatprep.subr.mxu0 %v747_v4  ;;  %1306 = vmatprep.subr.mxu1 %v1305_v8  ;;  %v1242_v4 = vsub.f32 %v2818_v11, %v2834_v50 }
  0xb2   :  { %v2314_v58 = vadd.f32 %v2313_v53, %v2312_v63  ;;  %887 = vmatmul.mubr.f32.gmra.mxu0 %v2643_v59  ;;  %1148 = vmatmul.mubr.f32.gmra.mxu1 %v2631_v55  ;;  %v2848_v59 = vld [vmem:[%s3324_s1 + $0x30] sm:$0xf]  ;;  %s2489_s1 = smov 102  }
  0xb3   :  { %1023 = vmatpush1.msra.mxu0 %v753_v10  ;;  %1056 = vmatprep.mubr.f32.mxu0 %v2487_v32  ;;  %3349 = vst [vmem:[#allocation10_spill] sm:$0xff] %v2848_v59  ;;  %v2859_v10 = vand.u32 4294901760, %v2829_v13  ;;  %v1165_v14 = vsel %vm61_vm0, %v2848_v59, 0  ;;  %v2877_v16 = vand.u32 4294901760, %v1242_v4 }
  0xb4   :  { %v2315_v1 = vmax.f32 %v2314_v58, 0.0  ;;  %1199 = vmatprep.subr.mxu0 %v2713_v19  ;;  %1312 = vmatpush1.msra.mxu1 %v1311_v49  ;;  %v2882_v22 = vand.u32 4294901760, %v1165_v14  ;;  %v2490_v49 = vmov 28  }
  0xb5   :  { %1345 = vmatprep.mubr.f32.mxu1 %v2487_v32  ;;  %1478 = vmatprep.subr.mxu1 %v2713_v19  ;;  %v1253_v18 = vsub.f32 %v2829_v13, %v2859_v10 }
  0xb6   :  { %2317 = vrot.lane.b32.xlu1 %v2315_v1, %s2488_s23  ;;  %1058 = vmatmul.mubr.f32.vlgmr.msra.gmra.mxu0 %v2612_v47  ;;  %v2867_v47 = vand.u32 4294901760, %v1168_v61  ;;  %v2909_v37 = vsub.f32 %v1165_v14, %v2882_v22 }
  0xb7   :  { %1347 = vmatmul.mubr.f32.vlgmr.msra.gmra.mxu1 %v2800_v62  ;;  %1063 = vmatprep.mubr.f32.mxu0 %v2487_v32  ;;  %v2905_v36 = vand.u32 4294901760, %v1253_v18 }
  0xb8   :  { %1201 = vmatpush1.msra.mxu0 %v2728_v24  ;;  %1352 = vmatprep.mubr.f32.mxu1 %v2487_v32  ;;  %v2898_v28 = vsub.f32 %v1168_v61, %v2867_v47  ;;  %v1837_v60 = vand.u32 4294901760, %v2909_v37 }
  0xb9   :  { %1203 = vmatprep.subr.mxu0 %v2733_v25  ;;  %1480 = vmatpush1.msra.mxu1 %v2728_v24 }
  0xba   :  { %1205 = vmatpush1.msra.mxu0 %v2754_v31  ;;  %1482 = vmatprep.subr.mxu1 %v2733_v25  ;;  %v1831_v44 = vand.u32 4294901760, %v2898_v28 }
  0xbb   :  { %1065 = vmatmul.mubr.f32.gmra.mxu0 %v2631_v55  ;;  %1390 = vmatprep.subr.mxu0 %v2736_v26  ;;  %v1849_v26 = vand.u32 4294901760, %v2927_v52 }
  0xbc   :  { %1238 = vmatprep.mubr.f32.mxu0 %v2487_v32  ;;  %1354 = vmatmul.mubr.f32.gmra.mxu1 %v2815_v9  ;;  %v2369_v55 = vpop.xlane.xlu0 %2368  ;;  %v1832_v2 = vsub.f32 %v2898_v28, %v1831_v44 }
  0xbd   :  { %1517 = vmatprep.mubr.f32.mxu1 %v2487_v32  ;;  %v2375_v29 = vmul.f32 0.00390625, %v2369_v55  ;;  %1484 = vmatpush1.msra.mxu1 %v2754_v31 }
  0xbe   :  { %1656 = vmatprep.subr.mxu1 %v2713_v19  ;;  %v1838_v19 = vsub.f32 %v2909_v37, %v1837_v60  ;;  %v1833_v6 = vand.u32 4294901760, %v1832_v2  ;;  %2454 = vset.pattern.permute.xlu0 %v2490_v49 }
  0xbf   :  { %1244 = vmatmul.mubr.f32.vlgmr.msra.gmra.mxu0 %v2877_v16  ;;  %v2377_v40 = vmul.f32 %v2375_v29, %v2522_v0  ;;  %2453 = vset.pattern.permute.xlu1 %v2490_v49 }
  0xc0   :  { %1249 = vmatprep.mubr.f32.mxu0 %v2487_v32  ;;  %1393 = vmatpush1.msra.mxu0 %v2751_v30  ;;  %v1850_v30 = vsub.f32 %v2927_v52, %v1849_v26 }
  0xc1   :  { %1396 = vmatprep.subr.mxu0 %v2761_v34  ;;  %1521 = vmatmul.mubr.f32.vlgmr.msra.gmra.mxu1 %v2834_v50  ;;  %v2379_v43 = vsel %vm2304_vm2, %v2377_v40, 0.0 }
  0xc2   :  { %1399 = vmatpush1.msra.mxu0 %v2775_v39  ;;  %1526 = vmatprep.mubr.f32.mxu1 %v2487_v32  ;;  %v2381_v56 = vadd.f32 %v2380_v41, %v2379_v43 }
  0xc3   :  { %1255 = vmatmul.mubr.f32.gmra.mxu0 %v2905_v36  ;;  %1567 = vmatprep.subr.mxu0 %v1291_v33 }
  0xc4   :  { %1432 = vmatprep.mubr.f32.mxu0 %v2487_v32  ;;  %v2382_v46 = vrot.slane %v2381_v56, 4  ;;  %1658 = vmatpush1.msra.mxu1 %v2728_v24 }
  0xc5   :  { %1530 = vmatmul.mubr.f32.gmra.mxu1 %v2859_v10  ;;  %1660 = vmatprep.subr.mxu1 %v2733_v25  ;;  %v1844_v25 = vsub.f32 %v2920_v45, %v1843_v48 }
  0xc6   :  { %1695 = vmatprep.mubr.f32.mxu1 %v2487_v32  ;;  %v2383_v33 = vadd.f32 %v2382_v46, %v2381_v56  ;;  %1662 = vmatpush1.msra.mxu1 %v2754_v31  ;;  %v1839_v31 = vand.u32 4294901760, %v1838_v19 }
  0xc7   :  { %1435 = vmatmul.mubr.f32.vlgmr.msra.gmra.mxu0 %v2818_v11  ;;  %1834 = vmatprep.subr.mxu1 %v1833_v6  ;;  %v1845_v39 = vand.u32 4294901760, %v1844_v25 }
  0xc8   :  { %1440 = vmatprep.mubr.f32.mxu0 %v2487_v32  ;;  %1571 = vmatpush1.msra.mxu0 %v1297_v38  ;;  %v2384_v24 = vrot.slane %v2383_v33, 2 }
  0xc9   :  { %1575 = vmatprep.subr.mxu0 %v1303_v42  ;;  %1697 = vmatmul.mubr.f32.vlgmr.msra.gmra.mxu1 %v2800_v62  ;;  %v1851_v42 = vand.u32 4294901760, %v1850_v30 }
  0xca   :  { %1579 = vmatpush1.msra.mxu0 %v1309_v51  ;;  %v2385_v34 = vadd.f32 %v2384_v24, %v2383_v33  ;;  %1702 = vmatprep.mubr.f32.mxu1 %v2487_v32 }
  0xcb   :  { %1443 = vmatmul.mubr.f32.gmra.mxu0 %v2829_v13  ;;  %1739 = vmatprep.subr.mxu0 %v2867_v47 }
  0xcc   :  { %1612 = vmatprep.mubr.f32.mxu0 %v2487_v32  ;;  %v2386_v38 = vrot.slane %v2385_v34, 1  ;;  %1840 = vmatpush1.msra.mxu1 %v1839_v31 }
  0xcd   :  { %1704 = vmatmul.mubr.f32.gmra.mxu1 %v2815_v9  ;;  %1846 = vmatprep.subr.mxu1 %v1845_v39 }
  0xce   :  { %v2387_v51 = vadd.f32 %v2386_v38, %v2385_v34  ;;  %1852 = vmatpush1.msra.mxu1 %v1851_v42  ;;  %1885 = vmatprep.mubr.f32.mxu1 %v2487_v32 }
  0xcf   :  { %1614 = vmatmul.mubr.f32.vlgmr.msra.gmra.mxu0 %v2800_v62  ;;  %2018 = vmatprep.subr.mxu1 %v2867_v47 }
  0xd0   :  { %1619 = vmatprep.mubr.f32.mxu0 %v2487_v32  ;;  %1741 = vmatpush1.msra.mxu0 %v2882_v22  ;;  %v2388_v63 = vmax.f32 %v2387_v51, 0.0 }
  0xd1   :  { %1743 = vmatprep.subr.mxu0 %v2895_v27  ;;  %1887 = vmatmul.mubr.f32.vlgmr.msra.gmra.mxu1 %v2800_v62 }
  0xd2   :  { %1745 = vmatpush1.msra.mxu0 %v2902_v35  ;;  %2390 = vrot.lane.b32.xlu1 %v2388_v63, %s2488_s23 }
  0xd3   :  { %1621 = vmatmul.mubr.f32.gmra.mxu0 %v2815_v9  ;;  %1930 = vmatprep.subr.mxu0 %v2898_v28 }
  0xd4   :  { %1778 = vmatprep.mubr.f32.mxu0 %v2487_v32  ;;  %1892 = vmatprep.mubr.f32.mxu1 %v2487_v32 }
  0xd5   :  { %2020 = vmatpush1.msra.mxu1 %v2882_v22 }
  0xd6   :  { %1894 = vmatmul.mubr.f32.gmra.mxu1 %v2815_v9  ;;  %2022 = vmatprep.subr.mxu1 %v2895_v27 }
  0xd7   :  { %1784 = vmatmul.mubr.f32.vlgmr.msra.gmra.mxu0 %v2877_v16  ;;  %2024 = vmatpush1.msra.mxu1 %v2902_v35 }
  0xd8   :  { %1789 = vmatprep.mubr.f32.mxu0 %v2487_v32  ;;  %1933 = vmatpush1.msra.mxu0 %v2909_v37 }
  0xd9   :  { %1936 = vmatprep.subr.mxu0 %v2920_v45  ;;  %2057 = vmatprep.mubr.f32.mxu1 %v2487_v32 }
  0xda   :  { %1939 = vmatpush1.msra.mxu0 %v2927_v52  ;;  %2061 = vmatmul.mubr.f32.vlgmr.msra.gmra.mxu1 %v2834_v50 }
  0xdb   :  { %1795 = vmatmul.mubr.f32.gmra.mxu0 %v2905_v36  ;;  %2107 = vmatprep.subr.mxu0 %v1831_v44 }
  0xdc   :  { %1972 = vmatprep.mubr.f32.mxu0 %v2487_v32  ;;  %2066 = vmatprep.mubr.f32.mxu1 %v2487_v32 }
  0xdd   :  { %2196 = vmatprep.subr.mxu1 %v2867_v47 }
  0xde   :  { %2198 = vmatpush1.msra.mxu1 %v2882_v22 }
  0xdf   :  { %1975 = vmatmul.mubr.f32.vlgmr.msra.gmra.mxu0 %v2818_v11  ;;  %2070 = vmatmul.mubr.f32.gmra.mxu1 %v2859_v10 }
  0xe0   :  { %1980 = vmatprep.mubr.f32.mxu0 %v2487_v32  ;;  %2111 = vmatpush1.msra.mxu0 %v1837_v60 }
  0xe1   :  { %2115 = vmatprep.subr.mxu0 %v1843_v48  ;;  %2200 = vmatprep.subr.mxu1 %v2895_v27 }
  0xe2   :  { %2119 = vmatpush1.msra.mxu0 %v1849_v26  ;;  %2202 = vmatpush1.msra.mxu1 %v2902_v35 }
  0xe3   :  { %1983 = vmatmul.mubr.f32.gmra.mxu0 %v2829_v13  ;;  %2235 = vmatprep.mubr.f32.mxu1 %v2487_v32 }
  0xe4   :  { %2152 = vmatprep.mubr.f32.mxu0 %v2487_v32  ;;  %2237 = vmatmul.mubr.f32.vlgmr.msra.gmra.mxu1 %v2800_v62 }
  0xe5   :  { %2242 = vmatprep.mubr.f32.mxu1 %v2487_v32 }
  0xe7   :  { %2154 = vmatmul.mubr.f32.vlgmr.msra.gmra.mxu0 %v2800_v62 }
  0xe8   :  { %2159 = vmatprep.mubr.f32.mxu0 %v2487_v32  ;;  %2244 = vmatmul.mubr.f32.gmra.mxu1 %v2815_v9 }
  0xeb   :  { %2161 = vmatmul.mubr.f32.gmra.mxu0 %v2815_v9 }
 0x128   :  { %v2318_v8 = vpop.permute.xlu1 %2317 }
 0x129   :  { %v2320_v11 = vmul.f32 %v2318_v8, %v2522_v0  ;;  %v2321_v53 = vmul.f32 %v2318_v8, %v2541_v7 }
 0x12b   :  { %2324 = vrot.lane.b32.xlu1 %v2320_v11, %s2489_s1 }
 0x12f   :  { %2326 = vrot.lane.b32.xlu1 %v2321_v53, %s2489_s1 }
 0x144   :  { %v2391_v58 = vpop.permute.xlu1 %2390 }
 0x145   :  { %v2393_v62 = vmul.f32 %v2391_v58, %v2522_v0  ;;  %v2394_v32 = vmul.f32 %v2391_v58, %v2541_v7 }
 0x146   :  { %v3028_v57 = vpop.f32.mrf.mxu1 }
 0x147   :  { %2399 = vrot.lane.b32.xlu1 %v2394_v32, %s2489_s1  ;;  %2397 = vrot.lane.b32.xlu0 %v2393_v62, %s2489_s1 }
 0x148   :  { %v3033_v3 = vpop.f32.mrf.mxu1 }
 0x14a   :  { %v3037_v47 = vpop.f32.mrf.mxu1 }
 0x14c   :  { %v3041_v18 = vpop.f32.mrf.mxu1 }
 0x14e   :  { %v3023_v13 = vpop.f32.mrf.mxu0  ;;  %v3045_v20 = vpop.f32.mrf.mxu1 }
 0x150   :  { %v3025_v50 = vpop.f32.mrf.mxu0  ;;  %v3049_v27 = vpop.f32.mrf.mxu1 }
 0x152   :  { %v3030_v4 = vpop.f32.mrf.mxu0  ;;  %v3053_v29 = vpop.f32.mrf.mxu1 }
 0x154   :  { %v3035_v14 = vpop.f32.mrf.mxu0  ;;  %v3059_v40 = vpop.f32.mrf.mxu1 }
 0x156   :  { %v3039_v16 = vpop.f32.mrf.mxu0  ;;  %v3064_v43 = vpop.f32.mrf.mxu1 }
 0x158   :  { %v3043_v22 = vpop.f32.mrf.mxu0  ;;  %v3068_v56 = vpop.f32.mrf.mxu1 }
 0x15a   :  { %v3047_v55 = vpop.f32.mrf.mxu0  ;;  %v3070_v60 = vpop.f32.mrf.mxu1 }
 0x15c   :  { %v3051_v28 = vpop.f32.mrf.mxu0  ;;  %v3074_v2 = vpop.f32.mrf.mxu1 }
 0x15e   :  { %v3056_v35 = vpop.f32.mrf.mxu0  ;;  %v3078_v26 = vpop.f32.mrf.mxu1 }
 0x160   :  { %v3061_v44 = vpop.f32.mrf.mxu0  ;;  %v3083_v19 = vpop.f32.mrf.mxu1 }
 0x162   :  { %v3066_v52 = vpop.f32.mrf.mxu0  ;;  %v3087_v6 = vpop.f32.mrf.mxu1 }
 0x164   :  { %v3091_v30 = vpop.f32.mrf.mxu1 }
 0x166   :  { %v3095_v31 = vpop.f32.mrf.mxu1 }
 0x168   :  { %v3099_v39 = vpop.f32.mrf.mxu1 }
 0x16a   :  { %v3103_v42 = vpop.f32.mrf.mxu1 }
 0x16b   :  { %3352 = vst [vmem:[#allocation13_spill] sm:$0xff] %v3103_v42 }
 0x16c   :  { %v3107_v63 = vpop.f32.mrf.mxu1 }
 0x16d   :  { %3354 = vst [vmem:[#allocation15_spill] sm:$0xff] %v3107_v63 }
 0x16e   :  { %v3111_v11 = vpop.f32.mrf.mxu1 }
 0x16f   :  { %3356 = vst [vmem:[#allocation17_spill] sm:$0xff] %v3111_v11 }
 0x170   :  { %v3115_v49 = vpop.f32.mrf.mxu1 }
 0x171   :  { %3358 = vst [vmem:[#allocation19_spill] sm:$0xff] %v3115_v49 }
 0x172   :  { %v3119_v62 = vpop.f32.mrf.mxu1 }
 0x173   :  { %3360 = vst [vmem:[#allocation21_spill] sm:$0xff] %v3119_v62 }
 0x19d   :  { %v2325_v9 = vpop.permute.xlu1 %2324 }
 0x19e   :  { %v2331_v1 = vsel %vm2330_vm4, %v2325_v9, 0.0  ;;  %v3123_v9 = vpop.f32.mrf.mxu1 }
 0x19f   :  { %2332 = vadd.xlane.f32.xlu1 %v2331_v1  ;;  %3361 = vst [vmem:[#allocation22_spill] sm:$0xff] %v3123_v9 }
 0x1a1   :  { %v2327_v61 = vpop.permute.xlu1 %2326 }
 0x1a2   :  { %v2335_v10 = vsel %vm2334_vm5, %v2327_v61, 0.0  ;;  %v3127_v61 = vpop.f32.mrf.mxu1 }
 0x1a3   :  { %2336 = vadd.xlane.f32.xlu0 %v2335_v10 }
 0x1b9   :  { %2255 = vperm.xlu0 %2454, %v2541_v7   ;;  %v2398_v36 = vpop.permute.xlu0 %2397  ;;  %v2400_v41 = vpop.permute.xlu1 %2399 }
 0x1ba   :  { %v2403_v37 = vsel %vm2330_vm4, %v2398_v36, 0.0  ;;  %v2406_v45 = vsel %vm2334_vm5, %v2400_v41, 0.0  ;;  %v528_v7 = vpop.f32.mrf.mxu0  ;;  %v3129_v36 = vpop.f32.mrf.mxu1 }
 0x1bb   :  { %2404 = vadd.xlane.f32.xlu1 %v2403_v37 }
 0x1bc   :  { %v3072_v46 = vpop.f32.mrf.mxu0  ;;  %v1355_v41 = vpop.f32.mrf.mxu1 }
 0x1be   :  { %v3076_v48 = vpop.f32.mrf.mxu0 }
 0x1bf   :  { %2407 = vadd.xlane.f32.xlu1 %v2406_v45  ;;  %v1357_v45 = vpop.f32.mrf.mxu1 }
 0x1c0   :  { %v3081_v33 = vpop.f32.mrf.mxu0 }
 0x1c1   :  { %v3135_v15 = vpop.f32.mrf.mxu1 }
 0x1c2   :  { %v3085_v24 = vpop.f32.mrf.mxu0  ;;  %3363 = vst [vmem:[#allocation24_spill] sm:$0xff] %v3135_v15  ;;  %v262_v15 = vadd.f32 %v3041_v18, %v3035_v14  ;;  %v255_v18 = vadd.f32 %v3033_v3, %v3025_v50 }
 0x1c3   :  { %v3137_v17 = vpop.f32.mrf.mxu1 }
 0x1c4   :  { %v3089_v25 = vpop.f32.mrf.mxu0  ;;  %3364 = vst [vmem:[#allocation25_spill] sm:$0xff] %v3137_v17  ;;  %v351_v63 = vadd.f32 %v3051_v28, %v262_v15  ;;  %v253_v15 = vadd.f32 %v3028_v57, %v3023_v13 }
 0x1c5   :  { %v1531_v12 = vpop.f32.mrf.mxu1 }
 0x1c6   :  { %v3093_v34 = vpop.f32.mrf.mxu0 }
 0x1c7   :  { %v1533_v5 = vpop.f32.mrf.mxu1 }
 0x1c8   :  { %v3097_v38 = vpop.f32.mrf.mxu0 }
 0x1c9   :  { %v3143_v49 = vpop.f32.mrf.mxu1 }
 0x1ca   :  { %3367 = vst [vmem:[#allocation28_spill] sm:$0xff] %v3143_v49  ;;  %v438_v49 = vadd.f32 %v3059_v40, %v351_v63  ;;  %v343_v40 = vadd.f32 %v3043_v22, %v255_v18 }
 0x1cb   :  { %v3145_v11 = vpop.f32.mrf.mxu1 }
 0x1cc   :  { %3368 = vst [vmem:[#allocation29_spill] sm:$0xff] %v3145_v11  ;;  %v529_v14 = vadd.f32 %v528_v7, %v438_v49  ;;  %v429_v3 = vadd.f32 %v3049_v27, %v343_v40 }
 0x1d0   :  { %2251 = vperm.xlu1 %2453, %v2522_v0   ;;  %v3101_v0 = vpop.f32.mrf.mxu0 }
 0x1d2   :  { %v3105_v51 = vpop.f32.mrf.mxu0 }
 0x1d3   :  { %3353 = vst [vmem:[#allocation14_spill] sm:$0xff] %v3105_v51 }
 0x1d4   :  { %v3109_v8 = vpop.f32.mrf.mxu0 }
 0x1d5   :  { %3355 = vst [vmem:[#allocation16_spill] sm:$0xff] %v3109_v8  ;;  %v3153_v8 = vpop.f32.mrf.mxu1 }
 0x1d6   :  { %v3113_v53 = vpop.f32.mrf.mxu0 }
 0x1d7   :  { %3357 = vst [vmem:[#allocation18_spill] sm:$0xff] %v3113_v53  ;;  %v260_v53 = vadd.f32 %v3037_v47, %v3030_v4  ;;  %v3157_v11 = vpop.f32.mrf.mxu1 }
 0x1d8   :  { %v3117_v58 = vpop.f32.mrf.mxu0 }
 0x1d9   :  { %3359 = vst [vmem:[#allocation20_spill] sm:$0xff] %v3117_v58  ;;  %v349_v17 = vadd.f32 %v3047_v55, %v260_v53  ;;  %v522_v53 = vadd.f32 %v3061_v44, %v429_v3  ;;  %v3376_v3 = vld [vmem:[#allocation25_spill] sm:$0xff] }
 0x1da   :  { %v3121_v32 = vpop.f32.mrf.mxu0 }
 0x1db   :  { %v605_v27 = vadd.f32 %v3068_v56, %v522_v53  ;;  %v800_v56 = vadd.f32 %v3087_v6, %v3081_v33  ;;  %v3377_v53 = vld [vmem:[#allocation17_spill] sm:$0xff] }
 0x1dc   :  { %v3125_v1 = vpop.f32.mrf.mxu0 }
 0x1de   :  { %v1256_v10 = vpop.f32.mrf.mxu0 }
 0x1e0   :  { %v1258_v37 = vpop.f32.mrf.mxu0 }
 0x1e2   :  { %v3131_v54 = vpop.f32.mrf.mxu0 }
 0x1e4   :  { %v3133_v59 = vpop.f32.mrf.mxu0 }
 0x1e5   :  { %3362 = vst [vmem:[#allocation23_spill] sm:$0xff] %v3133_v59 }
 0x1e6   :  { %v1444_v23 = vpop.f32.mrf.mxu0 }
 0x1e8   :  { %v1446_v21 = vpop.f32.mrf.mxu0 }
 0x1ea   :  { %v3139_v9 = vpop.f32.mrf.mxu0 }
 0x1eb   :  { %3365 = vst [vmem:[#allocation26_spill] sm:$0xff] %v3139_v9 }
 0x1ec   :  { %v3141_v62 = vpop.f32.mrf.mxu0 }
 0x1ed   :  { %3366 = vst [vmem:[#allocation27_spill] sm:$0xff] %v3141_v62  ;;  %v436_v62 = vadd.f32 %v3053_v29, %v349_v17  ;;  %v341_v17 = vadd.f32 %v3039_v16, %v253_v15  ;;  %v3169_v29 = vpop.f32.mrf.mxu1 }
 0x1ee   :  { %v1622_v58 = vpop.f32.mrf.mxu0 }
 0x1ef   :  { %v527_v4 = vadd.f32 %v3066_v52, %v436_v62  ;;  %v427_v57 = vadd.f32 %v3045_v20, %v341_v17  ;;  %v3177_v50 = vpop.f32.mrf.mxu1 }
 0x1f0   :  { %v1624_v42 = vpop.f32.mrf.mxu0 }
 0x1f1   :  { %v610_v52 = vadd.f32 %v3070_v60, %v527_v4  ;;  %v520_v16 = vadd.f32 %v3056_v35, %v427_v57  ;;  %v795_v35 = vadd.f32 %v3083_v19, %v3076_v48 }
 0x1f2   :  { %v3159_v51 = vpop.f32.mrf.mxu0 }
 0x1f3   :  { %v1257_v7 = vadd.f32 %v1256_v10, %v610_v52  ;;  %v603_v20 = vadd.f32 %v3064_v43, %v520_v16 }
 0x1f4   :  { %v3167_v28 = vpop.f32.mrf.mxu0 }
 0x1f5   :  { %v1356_v22 = vadd.f32 %v1355_v41, %v1257_v7  ;;  %v1246_v44 = vadd.f32 %v3121_v32, %v603_v20  ;;  %v802_v32 = vadd.f32 %v3091_v30, %v3085_v24 }
 0x1f6   :  { %v3175_v63 = vpop.f32.mrf.mxu0 }
 0x1f7   :  { %v1445_v62 = vadd.f32 %v1444_v23, %v1356_v22  ;;  %v1248_v23 = vadd.f32 %v3125_v1, %v605_v27  ;;  %v891_v33 = vadd.f32 %v3101_v0, %v802_v32  ;;  %v3370_v1 = vld [vmem:[#allocation23_spill] sm:$0xff]  ;;  %v3383_v32 = vld [vmem:[#allocation21_spill] sm:$0xff] }
 0x1f8   :  { %v3182_v60 = vpop.f32.mrf.mxu0 }
 0x1f9   :  { %v1532_v43 = vadd.f32 %v1531_v12, %v1445_v62  ;;  %v889_v12 = vadd.f32 %v3097_v38, %v800_v56  ;;  %v3378_v62 = vld [vmem:[#allocation20_spill] sm:$0xff]  ;;  %v3244_v56 = vstv %s48_s28 }
 0x1fb   :  { %v1623_v48 = vadd.f32 %v1622_v58, %v1532_v43 }
 0x1fd   :  { %v1706_v38 = vadd.f32 %v3153_v8, %v1623_v48  ;;  %v3375_v8 = vld [vmem:[#allocation18_spill] sm:$0xff] }
 0x228   :  { %v2333_v9 = vpop.xlane.xlu1 %2332 }
 0x229   :  { %v2443_v59 = vmul.f32 -1.442695, %v2333_v9 }
 0x22b   :  { %2455 = vpow2.f32 %v2443_v59  ;;  %v612_v59 = vadd.f32 %v3074_v2, %v529_v14  ;;  %v3184_v2 = vpop.f32.mrf.mxu1 }
 0x22c   :  { %v2337_v47 = vpop.xlane.xlu0 %2336 }
 0x22d   :  { %v2444_v55 = vmul.f32 -1.442695, %v2337_v47  ;;  %v1259_v13 = vadd.f32 %v1258_v37, %v612_v59  ;;  %v793_v37 = vadd.f32 %v3078_v26, %v3072_v46  ;;  %v3193_v41 = vpop.f32.mrf.mxu1  ;;  %v883_v46 = vadd.f32 %v3093_v34, %v795_v35  ;;  %v3373_v59 = vld [vmem:[#allocation15_spill] sm:$0xff] }
 0x22e   :  { %v1349_v47 = vadd.f32 %v3127_v61, %v1246_v44  ;;  %v1351_v34 = vadd.f32 %v3129_v36, %v1248_v23  ;;  %v978_v7 = vadd.f32 %v3373_v59, %v891_v33 }
 0x22f   :  { %2457 = vpow2.f32 %v2444_v55  ;;  %v1358_v49 = vadd.f32 %v1357_v45, %v1259_v13  ;;  %v3195_v45 = vpop.f32.mrf.mxu0  ;;  %v969_v6 = vadd.f32 %v3099_v39, %v883_v46  ;;  %v3371_v55 = vld [vmem:[#allocation16_spill] sm:$0xff]  ;;  %v3372_v39 = vld [vmem:[#allocation13_spill] sm:$0xff] }
 0x230   :  { %v1437_v24 = vadd.f32 %v3131_v54, %v1349_v47  ;;  %v1439_v61 = vadd.f32 %v3370_v1, %v1351_v34  ;;  %v976_v40 = vadd.f32 %v3372_v39, %v889_v12  ;;  %v3374_v13 = vld [vmem:[#allocation24_spill] sm:$0xff]  ;;  %v3384_v12 = vld [vmem:[#allocation22_spill] sm:$0xff] }
 0x231   :  { %v1447_v9 = vadd.f32 %v1446_v21, %v1358_v49  ;;  %v881_v21 = vadd.f32 %v3089_v25, %v793_v37  ;;  %v3205_v18 = vpop.f32.mrf.mxu0  ;;  %v3207_v25 = vpop.f32.mrf.mxu1  ;;  %v1062_v36 = vadd.f32 %v3371_v55, %v969_v6  ;;  %v3380_v37 = vld [vmem:[#allocation19_spill] sm:$0xff]  ;;  %v3256_v55 = vstv %s3231_s29 }
 0x232   :  { %v1523_v57 = vadd.f32 %v3374_v13, %v1437_v24  ;;  %v1525_v16 = vadd.f32 %v3376_v3, %v1439_v61  ;;  %v3389_v3 = vld [vmem:[#allocation7_spill] sm:$0xff] }
 0x233   :  { %v1534_v14 = vadd.f32 %v1533_v5, %v1447_v9  ;;  %v967_v5 = vadd.f32 %v3095_v31, %v881_v21  ;;  %v3222_v17 = vpop.f32.mrf.mxu0  ;;  %v3224_v0 = vpop.f32.mrf.mxu1  ;;  %v1069_v9 = vadd.f32 %v3378_v62, %v978_v7  ;;  %v1145_v27 = vadd.f32 %v3380_v37, %v1062_v36  ;;  %v3381_v21 = vld [vmem:[#allocation27_spill] sm:$0xff] }
 0x234   :  { %v3215_v30 = vpop.permute.xlu0 %2255  ;;  %v1618_v23 = vadd.f32 %v3381_v21, %v1525_v16 }
 0x235   :  { %v1625_v26 = vadd.f32 %v1624_v42, %v1534_v14  ;;  %v3369_v42 = vld [vmem:[#allocation14_spill] sm:$0xff]  ;;  %v2262_v54 = vadd.f32 %v3215_v30, %v1706_v38  ;;  %v1986_v35 = vpop.f32.mrf.mxu0  ;;  %v3239_v44 = vpop.f32.mrf.mxu1  ;;  %v1788_v46 = vadd.f32 %v3167_v28, %v1145_v27 }
 0x236   :  { %v1060_v58 = vadd.f32 %v3369_v42, %v967_v5  ;;  %v1152_v5 = vadd.f32 %v3384_v12, %v1069_v9 }
 0x237   :  { %v1708_v31 = vadd.f32 %v3157_v11, %v1625_v26  ;;  %v1067_v11 = vadd.f32 %v3375_v8, %v976_v40  ;;  %v2270_v14 = vmax.f32 %v2262_v54, 0.0  ;;  %v3382_v26 = vld [vmem:[#allocation28_spill] sm:$0xff]  ;;  %v2073_v34 = vpop.f32.mrf.mxu1  ;;  %v2155_v33 = vpop.f32.mrf.mxu0  ;;  %v3386_v40 = vld [vmem:[#allocation6_spill] sm:$0xff] }
 0x238   :  { %v2456_v10 = vpop.eup %2455  ;;  %v1143_v22 = vadd.f32 %v3377_v53, %v1060_v58  ;;  %v1799_v36 = vadd.f32 %v3182_v60, %v1152_v5 }
 0x239   :  { %v2344_v4 = vadd.f32 1.0, %v2456_v10  ;;  %v2263_v52 = vadd.f32 %v3215_v30, %v1708_v31  ;;  %v3379_v10 = vld [vmem:[#allocation26_spill] sm:$0xff]  ;;  %v1150_v47 = vadd.f32 %v3383_v32, %v1067_v11  ;;  %v2279_v28 = vmul.f32 %v3244_v56, %v2270_v14  ;;  %v2157_v7 = vpop.f32.mrf.mxu0  ;;  %v2238_v13 = vpop.f32.mrf.mxu1  ;;  %v3388_v11 = vld [vmem:[#allocation8_spill] sm:$0xff] }
 0x23a   :  { %v1616_v20 = vadd.f32 %v3379_v10, %v1523_v57  ;;  %v1786_v43 = vadd.f32 %v3159_v51, %v1143_v22  ;;  %v3385_v51 = vld [vmem:[#allocation29_spill] sm:$0xff]  ;;  %v1891_v31 = vadd.f32 %v3177_v50, %v1788_v46  ;;  %v1898_v10 = vadd.f32 %v3193_v41, %v1799_v36 }
 0x23b   :  { %2459 = vrcp.f32 %v2344_v4  ;;  %v1701_v42 = vadd.f32 %v3385_v51, %v1618_v23  ;;  %v1797_v38 = vadd.f32 %v3175_v63, %v1150_v47  ;;  %v2287_v16 = vadd.f32 %v2279_v28, %v3386_v40  ;;  %v2162_v27 = vpop.f32.mrf.mxu0 }
 0x23c   :  { %v2458_v15 = vpop.eup %2457  ;;  %v1889_v58 = vadd.f32 %v3169_v29, %v1786_v43  ;;  %v1979_v22 = vadd.f32 %v3205_v18, %v1891_v31  ;;  %v1987_v46 = vadd.f32 %v1986_v35, %v1898_v10 }
 0x23d   :  { %v2345_v19 = vadd.f32 1.0, %v2458_v15  ;;  %v2271_v15 = vmax.f32 %v2263_v52, 0.0  ;;  %v3387_v52 = vld [vmem:[#allocation5_spill] sm:$0xff]  ;;  %v1896_v9 = vadd.f32 %v3184_v2, %v1797_v38  ;;  %v2164_v32 = vpop.f32.mrf.mxu0 }
 0x23e   :  { %v1977_v39 = vadd.f32 %v3195_v45, %v1889_v58  ;;  %v2065_v2 = vadd.f32 %v3224_v0, %v1979_v22  ;;  %v3393_v22 = vld [vmem:[#allocation9_spill] sm:$0xff] }
 0x23f   :  { %2461 = vrcp.f32 %v2345_v19  ;;  %v1699_v19 = vadd.f32 %v3382_v26, %v1616_v20  ;;  %v2280_v1 = vmul.f32 %v3244_v56, %v2271_v15  ;;  %v1985_v15 = vadd.f32 %v3222_v17, %v1896_v9 }
 0x240   :  { %v2063_v18 = vadd.f32 %v3207_v25, %v1977_v39  ;;  %v2158_v25 = vadd.f32 %v2157_v7, %v2065_v2 }
 0x241   :  { %v2288_v53 = vadd.f32 %v2280_v1, %v3387_v52  ;;  %v2072_v5 = vadd.f32 %v3239_v44, %v1985_v15 }
 0x244   :  { %v2405_v49 = vpop.xlane.xlu1 %2404 }
 0x245   :  { %v2445_v4 = vmul.f32 -1.442695, %v2405_v49 }
 0x247   :  { %2463 = vpow2.f32 %v2445_v4  ;;  %v2240_v4 = vpop.f32.mrf.mxu1 }
 0x248   :  { %v2408_v48 = vpop.xlane.xlu1 %2407  ;;  %v2460_v24 = vpop.eup %2459 }
 0x249   :  { %v2446_v6 = vmul.f32 -1.442695, %v2408_v48  ;;  %v2350_v63 = vmul.f32 %v2460_v24, %v3388_v11  ;;  %v2351_v50 = vmul.f32 %v2460_v24, %v3389_v3  ;;  %v2245_v17 = vpop.f32.mrf.mxu1 }
 0x24b   :  { %2465 = vpow2.f32 %v2446_v6  ;;  %v2355_v43 = vmul.f32 %v3256_v55, %v2350_v63  ;;  %v2356_v14 = vmul.f32 %v3256_v55, %v2351_v50  ;;  %v2074_v6 = vadd.f32 %v2073_v34, %v1987_v46  ;;  %v2247_v58 = vpop.f32.mrf.mxu1 }
 0x24c   :  { %v2462_v61 = vpop.eup %2461  ;;  %v2252_v59 = vpop.permute.xlu1 %2251 }
 0x24d   :  { %v2352_v54 = vmul.f32 %v2462_v61, %v3386_v40  ;;  %v2353_v29 = vmul.f32 %v2462_v61, %v3387_v52  ;;  %v2258_v57 = vadd.f32 %v2252_v59, %v1699_v19  ;;  %v2259_v8 = vadd.f32 %v2252_v59, %v1701_v42 }
 0x24e   :  { %v2156_v19 = vadd.f32 %v2155_v33, %v2063_v18  ;;  %v2163_v33 = vadd.f32 %v2162_v27, %v2072_v5  ;;  %v2165_v24 = vadd.f32 %v2164_v32, %v2074_v6  ;;  %v2241_v42 = vadd.f32 %v2240_v4, %v2158_v25 }
 0x24f   :  { %v2357_v60 = vmul.f32 %v3256_v55, %v2352_v54  ;;  %v2358_v45 = vmul.f32 %v3256_v55, %v2353_v29  ;;  %v2266_v49 = vmax.f32 %v2258_v57, 0.0  ;;  %v2267_v62 = vmax.f32 %v2259_v8, 0.0  ;;  %v3391_v8 = vld [vmem:[#allocation11_spill] sm:$0xff] }
 0x250   :  { %v2239_v51 = vadd.f32 %v2238_v13, %v2156_v19  ;;  %v2261_v44 = vadd.f32 %v2252_v59, %v2241_v42  ;;  %v2246_v34 = vadd.f32 %v2245_v17, %v2163_v33  ;;  %v2248_v61 = vadd.f32 %v2247_v58, %v2165_v24  ;;  %v3390_v13 = vld [vmem:[#allocation12_spill] sm:$0xff] }
 0x251   :  { %v2361_v20 = vadd.f32 %v2357_v60, %v2287_v16  ;;  %v2362_v37 = vadd.f32 %v2358_v45, %v2288_v53  ;;  %v2275_v21 = vmul.f32 %v3244_v56, %v2266_v49  ;;  %v2276_v23 = vmul.f32 %v3244_v56, %v2267_v62  ;;  %v3392_v60 = vld [vmem:[#allocation10_spill] sm:$0xff] }
 0x252   :  { %v2260_v1 = vadd.f32 %v2252_v59, %v2239_v51  ;;  %v2264_v38 = vadd.f32 %v3215_v30, %v2246_v34  ;;  %v2265_v31 = vadd.f32 %v3215_v30, %v2248_v61  ;;  %v2269_v39 = vmax.f32 %v2261_v44, 0.0 }
 0x253   :  { %2365 = vst [vmem:[%s3327_s4 + $0x20] sm:$0xf] %v2361_v20  ;;  %2366 = vst [vmem:[%s3327_s4 + $0x28] sm:$0xf] %v2362_v37  ;;  %v2283_v41 = vadd.f32 %v2275_v21, %v3388_v11  ;;  %v2284_v48 = vadd.f32 %v2276_v23, %v3389_v3 }
 0x254   :  { %v2464_v26 = vpop.eup %2463  ;;  %v2268_v36 = vmax.f32 %v2260_v1, 0.0  ;;  %v2272_v40 = vmax.f32 %v2264_v38, 0.0  ;;  %v2273_v54 = vmax.f32 %v2265_v31, 0.0  ;;  %v2278_v29 = vmul.f32 %v3244_v56, %v2269_v39 }
 0x255   :  { %v2415_v35 = vadd.f32 1.0, %v2464_v26  ;;  %v2359_v47 = vadd.f32 %v2355_v43, %v2283_v41  ;;  %v2360_v12 = vadd.f32 %v2356_v14, %v2284_v48 }
 0x256   :  { %v2277_v52 = vmul.f32 %v3244_v56, %v2268_v36  ;;  %v2281_v59 = vmul.f32 %v3244_v56, %v2272_v40  ;;  %v2282_v63 = vmul.f32 %v3244_v56, %v2273_v54  ;;  %v2286_v30 = vadd.f32 %v2278_v29, %v3391_v8 }
 0x257   :  { %2467 = vrcp.f32 %v2415_v35  ;;  %2363 = vst [vmem:[%s3327_s4] sm:$0xff] %v2359_v47  ;;  %2364 = vst [vmem:[%s3327_s4 + $0x8] sm:$0xff] %v2360_v12 }
 0x258   :  { %v2466_v0 = vpop.eup %2465  ;;  %v2285_v3 = vadd.f32 %v2277_v52, %v3390_v13  ;;  %v2289_v10 = vadd.f32 %v2281_v59, %v3392_v60  ;;  %v2290_v20 = vadd.f32 %v2282_v63, %v3393_v22 }
 0x259   :  { %v2416_v28 = vadd.f32 1.0, %v2466_v0 }
 0x25b   :  { %2469 = vrcp.f32 %v2416_v28 }
 0x264   :  { %v2468_v7 = vpop.eup %2467 }
 0x265   :  { %v2421_v57 = vmul.f32 %v2468_v7, %v3390_v13  ;;  %v2422_v11 = vmul.f32 %v2468_v7, %v3391_v8 }
 0x267   :  { %v2425_v50 = vmul.f32 %v2421_v57, %v3256_v55  ;;  %v2426_v16 = vmul.f32 %v2422_v11, %v3256_v55 }
 0x268   :  { %v2470_v53 = vpop.eup %2469 }
 0x269   :  { %v2423_v45 = vmul.f32 %v2470_v53, %v3392_v60  ;;  %v2424_v49 = vmul.f32 %v2470_v53, %v3393_v22  ;;  %v2429_v62 = vadd.f32 %v2425_v50, %v2285_v3  ;;  %v2430_v9 = vadd.f32 %v2426_v16, %v2286_v30 }
 0x26b   :  { %v2427_v56 = vmul.f32 %v2423_v45, %v3256_v55  ;;  %v2428_v37 = vmul.f32 %v2424_v49, %v3256_v55  ;;  %2433 = vst [vmem:[%s3327_s4 + $0x10] sm:$0xff] %v2429_v62  ;;  %2434 = vst [vmem:[%s3327_s4 + $0x18] sm:$0xff] %v2430_v9 }
 0x26d   :  { %v2431_v27 = vadd.f32 %v2427_v56, %v2289_v10  ;;  %v2432_v4 = vadd.f32 %v2428_v37, %v2290_v20 }
 0x26f   :  { %2435 = vst [vmem:[%s3327_s4 + $0x30] sm:$0xf] %v2431_v27  ;;  %2436 = vst [vmem:[%s3327_s4 + $0x38] sm:$0xf] %v2432_v4 }
 0x270   :  { %2441 = vsyncpa [#allocation3], 1 }

</bundles_post_ra>
